<compile_context>
chip_gen: v7x
topology: tpu7x:2x2x1
jax: 0.10.0
libtpu: 0.0.40
codegen_flags: <defaults>
</compile_context>

<pallas_src>
import functools

import jax
import jax.numpy as jnp
from jax import lax
from jax.experimental import pallas as pl
from jax.experimental.pallas import tpu as pltpu


def _round_up(x, m):
    return ((x + m - 1) // m) * m


def _vmem_capacity_bytes():
    try:
        return int(pltpu.get_tpu_info().vmem_capacity_bytes)
    except Exception:
        return 64 * 1024 * 1024  # conservative (v7x-sized) fallback


def _working_set_bytes(bt, chan, tile_hw, hw_pad, in_itemsize, cd_itemsize,
                       use_slab):
    tiles = 2 * bt * chan * tile_hw * in_itemsize   # streamed input (dbl-buf)
    out = 2 * bt * chan * tile_hw * in_itemsize     # output tile (dbl-buf)
    gram = bt * chan * chan * 4                     # f32 accumulator
    xmat = bt * chan * chan * cd_itemsize           # softmax(X)
    slab = bt * chan * hw_pad * in_itemsize if use_slab else 0
    return tiles + out + gram + xmat + slab


def _select_tiling(n, chan, hw, in_dtype, compute_dtype, hw_tile_cap,
                   batch_tile_req, budget):
    """Pick (batch_tile, tile_hw, use_slab) from an explicit VMEM formula."""
    in_it = jnp.dtype(in_dtype).itemsize
    cd_it = jnp.dtype(compute_dtype).itemsize

    hw128 = _round_up(hw, 128)
    if hw_tile_cap is None:
        tile_cap = min(hw128, 2048)
    else:
        tile_cap = min(_round_up(hw_tile_cap, 128), hw128)
    tile_cands = [tile_cap] + [t for t in (2048, 1024, 512, 256, 128)
                               if t < tile_cap]

    if batch_tile_req is None:
        batch_tile_req = 4 if chan < 256 else 1
    # Keep >= 2 iterations on the 'parallel' batch axis whenever possible so a
    # 2-TensorCore chip (v7x) can shard it; harmless on 1-TC chips.
    max_bt = max(1, n // 2) if n >= 2 else 1
    bt_cands = [b for b in range(min(batch_tile_req, max_bt), 0, -1)
                if n % b == 0] or [1]

    # Priority: slab (drops HBM traffic ~33%) > big tile_hw (fewer grid steps,
    # less gram RMW) > batch packing (grid-step overhead only).
    for want_slab in (True, False):
        for tile_hw in tile_cands:
            hw_pad = _round_up(hw, tile_hw)
            n_tiles = hw_pad // tile_hw
            use_slab = want_slab and n_tiles > 1
            if want_slab and not use_slab:
                # Single tile: the pinned input block already stays resident in
                # VMEM, so a slab would be redundant.
                continue
            for bt in bt_cands:
                ws = _working_set_bytes(bt, chan, tile_hw, hw_pad, in_it,
                                        cd_it, use_slab)
                if ws <= budget:
                    return bt, tile_hw, use_slab
    # Nothing fits the formula (e.g. very large C makes the (bt,C,C) scratches
    # alone exceed budget): smallest config, no slab, let the compiler decide.
    # TODO(synk): a C-tiled gram/softmax variant would be needed for huge C.
    return 1, 128, False


def _cam_kernel(beta_ref, a_ref, o_ref, gram_ref, x_ref, *opt_slab,
                n_hw_tiles, compute_dtype, use_slab):
    slab_ref = opt_slab[0] if use_slab else None
    s = pl.program_id(1)

    # NOTE: correctness relies on the phase/HW axis being the LAST grid axis
    # (sequential, 'arbitrary'): gram_ref is cleared only at s == 0 and
    # accumulated across all phase-1 steps of one batch-tile.  Do not reorder
    # the grid axes without revisiting this.
    @pl.when(s == 0)
    def _():
        gram_ref[...] = jnp.zeros_like(gram_ref)

    # ---- Phase 1: stream HW tiles, stash them in the VMEM slab, accumulate
    # b = a @ a^T with f32 accumulation on the MXU. ----
    @pl.when(s < n_hw_tiles)
    def _():
        a_t = a_ref[...]                                   # (bt, C, thw) a.dtype
        if use_slab:
            slab_ref[s] = a_t                              # VMEM cache for phase 2
        a_c = a_t.astype(compute_dtype)
        gram_ref[...] += lax.dot_general(
            a_c, a_c,
            dimension_numbers=(((2,), (2,)), ((0,), (0,))),
            preferred_element_type=jnp.float32)            # (bt, C, C)

    # ---- Phase boundary: row softmax of the channel-affinity matrix (f32). ----
    @pl.when(s == n_hw_tiles)
    def _():
        b = gram_ref[...]
        m = jnp.max(b, axis=-1, keepdims=True)
        p = jnp.exp(b - m)
        denom = jnp.sum(p, axis=-1, keepdims=True)
        if jnp.dtype(compute_dtype) == jnp.dtype(jnp.bfloat16):
            # ~2^-12 relative error in normalization; below bf16 rounding.
            inv = pl.reciprocal(denom, approx=True)
        else:
            inv = 1.0 / denom
        x_ref[...] = (p * inv).astype(x_ref.dtype)

    # ---- Phase 2: c = X @ a (tiles re-read from VMEM slab, not HBM),
    # e = beta*c + a (residual from original-dtype data -> beta=0 is exact). ----
    @pl.when(s >= n_hw_tiles)
    def _():
        if use_slab:
            a_t = slab_ref[s - n_hw_tiles]                 # (bt, C, thw) a.dtype
        else:
            a_t = a_ref[...]                               # resident/streamed tile
        c = lax.dot_general(
            x_ref[...], a_t.astype(compute_dtype),
            dimension_numbers=(((2,), (1,)), ((0,), (0,))),
            preferred_element_type=jnp.float32)            # (bt, C, thw) f32
        o_ref[...] = (beta_ref[0] * c + a_t).astype(o_ref.dtype)


def channel_attention_block(a, beta, *, compute_dtype=jnp.bfloat16,
                            hw_tile=None, batch_tile=None):
    """a: (N, C, H, W), beta: (1,) -> (N, C, H, W)."""
    n, chan, height, width = a.shape
    hw = height * width

    capacity = _vmem_capacity_bytes()
    budget = (capacity * 3) // 4  # leave Mosaic internal-scratch headroom

    bt, tile_hw, use_slab = _select_tiling(
        n, chan, hw, a.dtype, compute_dtype, hw_tile, batch_tile, budget)

    hw_pad = _round_up(hw, tile_hw)
    n_hw_tiles = hw_pad // tile_hw

    a_flat = a.reshape(n, chan, hw)
    if hw_pad != hw:
        a_flat = jnp.pad(a_flat, ((0, 0), (0, 0), (0, hw_pad - hw)))

    kernel = functools.partial(_cam_kernel, n_hw_tiles=n_hw_tiles,
                               compute_dtype=compute_dtype, use_slab=use_slab)

    scratch_shapes = [
        pltpu.VMEM((bt, chan, chan), jnp.float32),    # gram accumulator
        pltpu.VMEM((bt, chan, chan), compute_dtype),  # softmax(X)
    ]
    if use_slab:
        scratch_shapes.append(
            pltpu.VMEM((n_hw_tiles, bt, chan, tile_hw), a.dtype))  # tile cache

    if use_slab:
        # Pin the input block during phase 2 -> no phase-2 input DMAs.
        in_map = lambda i, s: (i, 0, jnp.minimum(s, n_hw_tiles - 1))
    else:
        in_map = lambda i, s: (i, 0, s % n_hw_tiles)

    itemsize = jnp.dtype(a.dtype).itemsize
    n_reads = 1 if (use_slab or n_hw_tiles == 1) else 2
    cost = pl.CostEstimate(
        flops=4 * n * chan * chan * hw,
        transcendentals=n * chan * chan,
        bytes_accessed=(n_reads + 1) * n * chan * hw * itemsize,
    )

    # Only raise the scoped VMEM limit when the working set needs it (v7x /
    # large shapes); keeps small shapes on the well-trodden default path.
    ws = _working_set_bytes(bt, chan, tile_hw, hw_pad, itemsize,
                            jnp.dtype(compute_dtype).itemsize, use_slab)
    cp_kwargs = dict(dimension_semantics=("parallel", "arbitrary"))
    if ws > 24 * 1024 * 1024:
        cp_kwargs["vmem_limit_bytes"] = int(budget)

    out_flat = pl.pallas_call(
        kernel,
        out_shape=jax.ShapeDtypeStruct((n, chan, hw_pad), a.dtype),
        grid_spec=pltpu.PrefetchScalarGridSpec(
            num_scalar_prefetch=0,
            # Phase axis runs the HW tiles twice: gram pass then apply pass.
            grid=(n // bt, 2 * n_hw_tiles),
            in_specs=[
                pl.BlockSpec(memory_space=pltpu.SMEM),            # beta (1,)
                pl.BlockSpec((bt, chan, tile_hw), in_map),
            ],
            out_specs=pl.BlockSpec(
                (bt, chan, tile_hw),
                # Pinned to tile 0 during phase 1 (no writebacks), then tracks
                # the streamed tile during phase 2.
                lambda i, s: (i, 0, jnp.maximum(s - n_hw_tiles, 0))),
            scratch_shapes=scratch_shapes,
        ),
        compiler_params=pltpu.CompilerParams(**cp_kwargs),
        cost_estimate=cost,
    )(beta, a_flat)

    if hw_pad != hw:
        out_flat = out_flat[:, :, :hw]
    return out_flat.reshape(n, chan, height, width)


def _reference(a, beta, compute_dtype=jnp.float32):
    """Pure-JAX reference mirroring the kernel's operand casting."""
    n, chan, h, w = a.shape
    ap = a.reshape(n, chan, h * w)
    ap_c = ap.astype(compute_dtype)
    b = jnp.einsum("ncs,nds->ncd", ap_c, ap_c,
                   preferred_element_type=jnp.float32)
    x = jax.nn.softmax(b, axis=-1).astype(compute_dtype)
    c = jnp.einsum("ncd,nds->ncs", x, ap_c,
                   preferred_element_type=jnp.float32)
    e = (beta[0] * c + ap.astype(jnp.float32)).astype(a.dtype)
    return e.reshape(n, chan, h, w)


if __name__ == "__main__":
    key = jax.random.PRNGKey(0)
    n, chan, height, width = 2, 4, 16, 16
    a = jax.random.normal(key, (n, chan, height, width), dtype=jnp.float32)

    # --- Test 1: module init (beta = 0) -> output equals the input exactly. ---
    beta0 = jnp.zeros((1,), dtype=jnp.float32)
    out0 = jax.block_until_ready(channel_attention_block(a, beta0))
    assert out0.shape == (n, chan, height, width)
    assert jnp.allclose(out0, a, atol=1e-6, rtol=1e-6)

    # --- Test 2: non-trivial beta, f32 compute path, tight tolerance. ---
    beta1 = jnp.full((1,), 0.5, dtype=jnp.float32)
    out1 = jax.block_until_ready(
        channel_attention_block(a, beta1, compute_dtype=jnp.float32))
    ref1 = _reference(a, beta1, compute_dtype=jnp.float32)
    assert jnp.allclose(out1, ref1, atol=1e-4, rtol=1e-4)

    # --- Test 3: default bf16 MXU path vs bf16-casting reference. ---
    out2 = jax.block_until_ready(channel_attention_block(a, beta1))
    ref2 = _reference(a, beta1, compute_dtype=jnp.bfloat16)
    assert jnp.allclose(out2, ref2, atol=1e-2, rtol=1e-2)

    # --- Test 4: non-multiple-of-128 spatial size, multi-tile streaming,
    #             exercises the VMEM slab (phase-2 reads from VMEM cache). ---
    a2 = jax.random.normal(jax.random.PRNGKey(1), (2, 8, 20, 20), jnp.float32)
    beta2 = jnp.full((1,), 0.25, dtype=jnp.float32)
    out3 = jax.block_until_ready(
        channel_attention_block(a2, beta2, compute_dtype=jnp.float32,
                                hw_tile=128))
    ref3 = _reference(a2, beta2, compute_dtype=jnp.float32)
    assert jnp.allclose(out3, ref3, atol=1e-2, rtol=1e-2)

    # --- Test 5: batch packing (bt > 1) with the batch axis still >= 2 grid
    #             iterations (v7x-friendly), default bf16 path. ---
    a3 = jax.random.normal(jax.random.PRNGKey(2), (4, 4, 16, 16), jnp.float32)
    beta3 = jnp.full((1,), 0.3, dtype=jnp.float32)
    out4 = jax.block_until_ready(channel_attention_block(a3, beta3))
    ref4 = _reference(a3, beta3, compute_dtype=jnp.bfloat16)
    assert jnp.allclose(out4, ref4, atol=1e-2, rtol=1e-2)

    print("KERNEL_OK")
</pallas_src>

<mosaic_0001>
module attributes {stable_mosaic.version = 11 : i64} {
  func.func @_cam_kernel(%arg0: i32, %arg1: i32, %arg2: memref<1xf32, #tpu.memory_space<smem>>, %arg3: memref<1x4x128xf32, #tpu.memory_space<vmem>>, %arg4: memref<1x4x128xf32, #tpu.memory_space<vmem>>, %arg5: memref<1x4x4xf32, #tpu.memory_space<vmem>>, %arg6: memref<1x4x4xbf16, #tpu.memory_space<vmem>>, %arg7: memref<2x1x4x128xf32, #tpu.memory_space<vmem>>) attributes {dimension_semantics = [#tpu.dimension_semantics<parallel>, #tpu.dimension_semantics<arbitrary>], iteration_bounds = array<i64: 2, 4>, scalar_prefetch = 0 : i64, scratch_operands = 3 : i64, tpu.core_type = #tpu.core_type<tc>, window_params = [{transform_indices = @transform_0, window_bounds = array<i64: 1>}, {transform_indices = @transform_1, window_bounds = array<i64: 1, 4, 128>}, {transform_indices = @transform_2, window_bounds = array<i64: 1, 4, 128>}]} {
    %c0_i32 = arith.constant 0 : i32
    %0 = arith.cmpi eq, %arg1, %c0_i32 : i32
    %1 = arith.extui %0 : i1 to i32
    %c0_i32_0 = arith.constant 0 : i32
    %2 = arith.cmpi ne, %1, %c0_i32_0 : i32
    scf.if %2 {
      %cst = arith.constant 0.000000e+00 : f32
      %12 = vector.broadcast %cst : f32 to vector<1x4x4xf32>
      %c0 = arith.constant 0 : index
      %c0_6 = arith.constant 0 : index
      %c0_7 = arith.constant 0 : index
      %13 = vector.load %arg5[%c0, %c0_6, %c0_7] : memref<1x4x4xf32, #tpu.memory_space<vmem>>, vector<1x4x4xf32>
      tpu.vector_store %arg5[%c0, %c0_6, %c0_7], %12 {strides = array<i32>} : memref<1x4x4xf32, #tpu.memory_space<vmem>>, vector<1x4x4xf32>,
    } else {
    }
    %c2_i32 = arith.constant 2 : i32
    %3 = arith.cmpi slt, %arg1, %c2_i32 : i32
    %4 = arith.extui %3 : i1 to i32
    %c0_i32_1 = arith.constant 0 : i32
    %5 = arith.cmpi ne, %4, %c0_i32_1 : i32
    scf.if %5 {
      %c0 = arith.constant 0 : index
      %c0_6 = arith.constant 0 : index
      %c0_7 = arith.constant 0 : index
      %12 = vector.load %arg3[%c0, %c0_6, %c0_7] : memref<1x4x128xf32, #tpu.memory_space<vmem>>, vector<1x4x128xf32>
      %13 = arith.index_cast %arg1 : i32 to index
      %c0_8 = arith.constant 0 : index
      %c0_9 = arith.constant 0 : index
      %c0_10 = arith.constant 0 : index
      %14 = vector.load %arg7[%13, %c0_8, %c0_9, %c0_10] : memref<2x1x4x128xf32, #tpu.memory_space<vmem>>, vector<1x1x4x128xf32>
      %15 = vector.shape_cast %14 : vector<1x1x4x128xf32> to vector<1x4x128xf32>
      %16 = vector.shape_cast %12 : vector<1x4x128xf32> to vector<1x1x4x128xf32>
      tpu.vector_store %arg7[%13, %c0_8, %c0_9, %c0_10], %16 {strides = array<i32>} : memref<2x1x4x128xf32, #tpu.memory_space<vmem>>, vector<1x1x4x128xf32>,
      %17 = arith.truncf %12 : vector<1x4x128xf32> to vector<1x4x128xbf16>
      %c0_11 = arith.constant 0 : index
      %c0_12 = arith.constant 0 : index
      %c0_13 = arith.constant 0 : index
      %18 = vector.load %arg5[%c0_11, %c0_12, %c0_13] : memref<1x4x4xf32, #tpu.memory_space<vmem>>, vector<1x4x4xf32>
      %cst = arith.constant dense<0.000000e+00> : vector<1x4x4xf32>
      %19 = tpu.matmul %17, %17, %cst {dimension_numbers = #tpu.dot_dimension_numbers<[2], [2], [1], [1], [0, 0, 0, 1, 1, 1], [0], [0]>} : vector<1x4x128xbf16>, vector<1x4x128xbf16>, vector<1x4x4xf32> -> vector<1x4x4xf32>
      %20 = arith.addf %18, %19 : vector<1x4x4xf32>
      %c0_14 = arith.constant 0 : index
      %c0_15 = arith.constant 0 : index
      %c0_16 = arith.constant 0 : index
      %21 = vector.load %arg5[%c0_14, %c0_15, %c0_16] : memref<1x4x4xf32, #tpu.memory_space<vmem>>, vector<1x4x4xf32>
      tpu.vector_store %arg5[%c0_14, %c0_15, %c0_16], %20 {strides = array<i32>} : memref<1x4x4xf32, #tpu.memory_space<vmem>>, vector<1x4x4xf32>,
    } else {
    }
    %c2_i32_2 = arith.constant 2 : i32
    %6 = arith.cmpi eq, %arg1, %c2_i32_2 : i32
    %7 = arith.extui %6 : i1 to i32
    %c0_i32_3 = arith.constant 0 : i32
    %8 = arith.cmpi ne, %7, %c0_i32_3 : i32
    scf.if %8 {
      %c0 = arith.constant 0 : index
      %c0_6 = arith.constant 0 : index
      %c0_7 = arith.constant 0 : index
      %12 = vector.load %arg5[%c0, %c0_6, %c0_7] : memref<1x4x4xf32, #tpu.memory_space<vmem>>, vector<1x4x4xf32>
      %cst = arith.constant dense<0xFF800000> : vector<1x4xf32>
      %13 = vector.multi_reduction <maximumf>, %12, %cst [2] : vector<1x4x4xf32> to vector<1x4xf32>
      %14 = vector.shape_cast %13 : vector<1x4xf32> to vector<1x4x1xf32>
      %15 = vector.broadcast %14 : vector<1x4x1xf32> to vector<1x4x4xf32>
      %16 = arith.subf %12, %15 : vector<1x4x4xf32>
      %17 = math.exp %16 : vector<1x4x4xf32>
      %cst_8 = arith.constant dense<0.000000e+00> : vector<1x4xf32>
      %18 = vector.multi_reduction <add>, %17, %cst_8 [2] : vector<1x4x4xf32> to vector<1x4xf32>
      %19 = vector.shape_cast %18 : vector<1x4xf32> to vector<1x4x1xf32>
      %20 = tpu.reciprocal %19 {approx = true} : vector<1x4x1xf32> -> vector<1x4x1xf32>
      %21 = vector.broadcast %20 : vector<1x4x1xf32> to vector<1x4x4xf32>
      %22 = arith.mulf %17, %21 : vector<1x4x4xf32>
      %23 = arith.truncf %22 : vector<1x4x4xf32> to vector<1x4x4xbf16>
      %c0_9 = arith.constant 0 : index
      %c0_10 = arith.constant 0 : index
      %c0_11 = arith.constant 0 : index
      %24 = vector.load %arg6[%c0_9, %c0_10, %c0_11] : memref<1x4x4xbf16, #tpu.memory_space<vmem>>, vector<1x4x4xbf16>
      tpu.vector_store %arg6[%c0_9, %c0_10, %c0_11], %23 {strides = array<i32>} : memref<1x4x4xbf16, #tpu.memory_space<vmem>>, vector<1x4x4xbf16>,
    } else {
    }
    %c2_i32_4 = arith.constant 2 : i32
    %9 = arith.cmpi sge, %arg1, %c2_i32_4 : i32
    %10 = arith.extui %9 : i1 to i32
    %c0_i32_5 = arith.constant 0 : i32
    %11 = arith.cmpi ne, %10, %c0_i32_5 : i32
    scf.if %11 {
      %c2_i32_6 = arith.constant 2 : i32
      %12 = arith.subi %arg1, %c2_i32_6 : i32
      %13 = arith.index_cast %12 : i32 to index
      %c0 = arith.constant 0 : index
      %c0_7 = arith.constant 0 : index
      %c0_8 = arith.constant 0 : index
      %14 = vector.load %arg7[%13, %c0, %c0_7, %c0_8] : memref<2x1x4x128xf32, #tpu.memory_space<vmem>>, vector<1x1x4x128xf32>
      %15 = vector.shape_cast %14 : vector<1x1x4x128xf32> to vector<1x4x128xf32>
      %c0_9 = arith.constant 0 : index
      %c0_10 = arith.constant 0 : index
      %c0_11 = arith.constant 0 : index
      %16 = vector.load %arg6[%c0_9, %c0_10, %c0_11] : memref<1x4x4xbf16, #tpu.memory_space<vmem>>, vector<1x4x4xbf16>
      %17 = arith.truncf %15 : vector<1x4x128xf32> to vector<1x4x128xbf16>
      %cst = arith.constant dense<0.000000e+00> : vector<1x4x128xf32>
      %18 = tpu.matmul %16, %17, %cst {dimension_numbers = #tpu.dot_dimension_numbers<[2], [1], [1], [2], [0, 0, 0, 1, 1, 2], [0], [0]>} : vector<1x4x4xbf16>, vector<1x4x128xbf16>, vector<1x4x128xf32> -> vector<1x4x128xf32>
      %c0_12 = arith.constant 0 : index
      %19 = memref.load %arg2[%c0_12] : memref<1xf32, #tpu.memory_space<smem>>
      %20 = vector.broadcast %19 : f32 to vector<1x4x128xf32>
      %21 = arith.mulf %20, %18 : vector<1x4x128xf32>
      %22 = arith.addf %21, %15 : vector<1x4x128xf32>
      %c0_13 = arith.constant 0 : index
      %c0_14 = arith.constant 0 : index
      %c0_15 = arith.constant 0 : index
      %23 = vector.load %arg4[%c0_13, %c0_14, %c0_15] : memref<1x4x128xf32, #tpu.memory_space<vmem>>, vector<1x4x128xf32>
      tpu.vector_store %arg4[%c0_13, %c0_14, %c0_15], %22 {strides = array<i32>} : memref<1x4x128xf32, #tpu.memory_space<vmem>>, vector<1x4x128xf32>,
    } else {
    }
    return
  }
  func.func @transform_0(%arg0: i32, %arg1: i32) -> i32 {
    %c0_i32 = arith.constant 0 : i32
    %c0_i32_0 = arith.constant 0 : i32
    return %c0_i32 : i32
  }
  func.func @transform_1(%arg0: i32, %arg1: i32) -> (i32, i32, i32) {
    %c1_i32 = arith.constant 1 : i32
    %0 = arith.minsi %arg1, %c1_i32 : i32
    %c0_i32 = arith.constant 0 : i32
    %c0_i32_0 = arith.constant 0 : i32
    return %arg0, %c0_i32, %0 : i32, i32, i32
  }
  func.func @transform_2(%arg0: i32, %arg1: i32) -> (i32, i32, i32) {
    %c2_i32 = arith.constant 2 : i32
    %0 = arith.subi %arg1, %c2_i32 : i32
    %c0_i32 = arith.constant 0 : i32
    %1 = arith.maxsi %0, %c0_i32 : i32
    %c0_i32_0 = arith.constant 0 : i32
    %c0_i32_1 = arith.constant 0 : i32
    return %arg0, %c0_i32_0, %1 : i32, i32, i32
  }
}

</mosaic_0001>

<bundles_post_ra>
// kernel: tpu_custom_call.1
= control target key start
LH: loop header
LB: loop body
LE: loop exit
PB: predicated region body
PF: predicated region fallthrough
CT: control target
= control target key end

     0   :  { %s1023_s0 = inlined_call_operand.<no memory space> [shape: f32[1], index: 0, kind: input, shape index: {}]   ;;  %s1024_s1 = inlined_call_operand.hbm [shape: f32[2,4,256], index: 1, kind: input, shape index: {}]   ;;  %s1025_s2 = inlined_call_operand.hbm [shape: f32[2,4,256], index: 2, kind: output, shape index: {}]  }
   0x1   :  { %7 = sst [smem:[#allocation5]] %s1023_s0 }
   0x2   :  { %8 = vsyncpa [#allocation7], 0 }
   0x3   :  { %10 = vsyncpa [#allocation7 + $0x1], 0 }
   0x4   :  { %11 = vsyncpa [#allocation8], 0 }
   0x5   :  { %13 = vsyncpa [#allocation8 + $0x1], 0  ;;  %s778_s11 = smov 0   ;;  %s780_s12 = smov 0  }
   0x6   :  { %s782_s13 = smov 0   ;;  %s784_s14 = smov 0  }
   0x7   :  { %s786_s15 = smov 0   ;;  %s788_s16 = smov 0  }
   0x8   :  { %s790_s17 = smov 0   ;;  %s792_s18 = smov 0  }
   0x9   :  { %s794_s0 = smov 0   ;;  %s796_s19 = smov 0  }
   0xa   :  { %s798_s20 = smov 0  }
   0xb LB: > { %s446_s21 = sadd.s32 4294967295, %s751_s20   ;;  %s447_s22 = sadd.s32 4294967294, %s751_s20   ;;  %s751_s20 = sphi %s798_s20, %s19_s20   ;;  %s747_s19 = sphi %s796_s19, %s1051_s19   ;;  %s743_s0 = sphi %s794_s0, %s1050_s0   ;;  %s739_s18 = sphi %s792_s18, %s1049_s18   ;;  %s735_s17 = sphi %s790_s17, %s1048_s17   ;;  %s731_s16 = sphi %s788_s16, %s1047_s16   ;;  %s727_s15 = sphi %s786_s15, %s1046_s15   ;;  %s723_s14 = sphi %s784_s14, %s1045_s14   ;;  %s719_s13 = sphi %s782_s13, %s1044_s13   ;;  %s715_s12 = sphi %s780_s12, %s1043_s12   ;;  %s711_s11 = sphi %s778_s11, %s1042_s11  }
   0xc   : > { %s28_s23 = sadd.s32 1, %s743_s0  ;;  %s31_s24 = sadd.s32 1, %s747_s19 }
   0xd   : > { %p29_p0 = scmp.ge.s32.totalorder %s28_s23, 4  ;;  %p56_p1 = scmp.lt.s32.totalorder %s743_s0, 1 }
   0xe   : > { %s65_s25 = sadd.s32 1, %s731_s16  ;;  %p72_p2 = scmp.ne.s32.totalorder %s731_s16, %s727_s15 }
   0xf   : > { %s1053_s23 = smov (%p29_p0, %s28_s23), 0  ;;  %s1055_s24 = smov (!%p29_p0, %s31_s24), %s747_s19 }
  0x10   : > { %1029 = sst [smem:[#allocation12_spill]] %s1053_s23  ;;  %p33_p3 = scmp.ge.s32.totalorder %s1055_s24, 2 }
  0x11   : > { %s845_s26 = scalar_select %p56_p1, %s743_s0, 1 }
  0x12   : > { %p58_p4 = scmp.lt.s32.totalorder %s1053_s23, 1  ;;  %p73_p5 = scmp.eq.s32.totalorder %s751_s20, 0 }
  0x13   : > { %p78_p6 = scmp.ne.s32.totalorder %s727_s15, %s723_s14  ;;  %s1057_s24 = smov (%p33_p3, %s1055_s24), 0 }
  0x14   : > { %1030 = sst [smem:[#allocation13_spill]] %s1057_s24  ;;  %s60_s28 = ssub.s32 %s747_s19, %s1057_s24 }
  0x15   : > { %s59_s27 = scalar_select %p58_p4, %s1053_s23, 1 }
  0x16   : > { %p856_p7 = por %p73_p5, %p72_p2  ;;  %p79_p8 = scmp.eq.s32.totalorder %s446_s21, 0 }
  0x17   : > { %s61_s30 = ssub.s32 %s845_s26, %s59_s27  ;;  %s448_s4 = sadd.s32 4294967294, %s743_s0 }
  0x18   : > { %s62_s3 = sor.u32 %s61_s30, %s60_s28  ;;  %p864_p10 = por %p79_p8, %p78_p6 }
  0x19   : > { %p63_p9 = scmp.eq.s32.totalorder %s62_s3, 0  ;;  %p89_p11 = scmp.gt.s32.totalorder %s448_s4, 0 }
  0x1a   : > { %s449_s6 = sadd.s32 4294967294, %s1053_s23  ;;  %s99_s8 = sadd.s32 1, %s719_s13 }
  0x1b   : > { %s870_s7 = scalar_select %p63_p9, %s731_s16, %s65_s25  }
  0x1c   : > { %s1059_s4 = smov (!%p89_p11, %s448_s4), 0  ;;  %p92_p12 = scmp.gt.s32.totalorder %s449_s6, 0 }
  0x1d   : > { %p109_p13 = scmp.ne.s32.totalorder %s719_s13, %s715_s12  ;;  %p110_p0 = scmp.eq.s32.totalorder %s446_s21, 7 }
  0x1e   : > { %s1061_s6 = smov (!%p92_p12, %s449_s6), 0  ;;  %p115_p2 = scmp.ne.s32.totalorder %s715_s12, %s711_s11 }
  0x1f   : > { %p877_p1 = por %p110_p0, %p109_p13  ;;  %s95_s10 = ssub.s32 %s1059_s4, %s1061_s6 }
  0x20   : > { %p116_p3 = scmp.eq.s32.totalorder %s447_s22, 7  ;;  %s96_s14 = sor.u32 %s95_s10, %s60_s28 }
  0x21   : > { %s1033_s9 = scalar_select %p877_p1, 1, 0 }
  0x22   : > { %p97_p4 = scmp.eq.s32.totalorder %s96_s14, 0  ;;  %p885_p5 = por %p116_p3, %p115_p2 }
  0x23   : > { %p500_p6 = scmp.lt.s32.totalorder %s751_s20, 8  ;;  %s139_s21 = sand.u32 1, %s731_s16  }
  0x24   : > { %s1034_s25 = scalar_select %p885_p5, 1, 0 }
  0x25   : > { %s892_s27 = scalar_select %p97_p4, %s719_s13, %s99_s8  }
  0x26   : > { %s452_s30 = sshll.u32 %s139_s21, 2  ;;  %s453_s3 = sshll.u32 %s747_s19, 1 }
  0x27   : > { %s150_s24 = sadd.s32 %s453_s3, %s845_s26  ;;  %s143_s23 = scalar_lea.vmem [#allocation6], %s452_s30 }
  0x28   : > { %s154_s4 = sshll.u32 %s143_s23, 4  ;;  %s454_s6 = sshll.u32 %s150_s24, 6  ;;  %s896_s4 = int_to_ptr.vmem [resolvable:$true] %s154_s4 }
  0x29   : > { %s901_s10 = scalar_lea.hbm %s1024_s1, %s454_s6  ;;  %p905_p8 = pnand %p500_p6, %p856_p7 }
  0x2a   : > { %s140_s23 = scalar_lea.sflag [#allocation7], %s139_s21  ;;  %s599_s24 = scalar_lea.hbm %s901_s10, 64 }
  0x2b   : > { %p600_p12 = scmp.ne.s32.totalorder %s901_s10, %s599_s24  ;;  %p601_p13 = pneg %p905_p8 }
  0x2c   : > { %s604_s14 = scalar_lea.hbm %s1024_s1, 256  ;;  %p605_p7 = scmp.lt.u32.totalorder %s901_s10, %s1024_s1 }
  0x2d   : > { %p602_p0 = pnand %p601_p13, %p600_p12  ;;  %p606_p3 = scmp.lt.u32.totalorder %s604_s14, %s599_s24 }
  0x2e   : > { %p608_p6 = scmp.lt.u32.totalorder %s599_s24, %s901_s10 }
  0x2f   : > { %p603_p2 = pneg %p602_p0  ;;  %p607_p4 = por %p606_p3, %p605_p7 }
  0x31   : > { %p609_p9 = por %p608_p6, %p607_p4 }
  0x33   : > { %p610_p11 = pnand %p609_p9, %p603_p2 }
  0x35   : > { %613 = shalt.err (!%p610_p11)
}
  0x36   : > { %s614_s21 = scalar_lea.vmem %s896_s4, 64  ;;  %s753_s6 = smov [#allocation6]  }
  0x37   : > { %p615_p12 = scmp.ne.s32.totalorder %s896_s4, %s614_s21  ;;  %s619_s22 = sshll.u32 %s753_s6, 4  ;;  %s620_s22 = int_to_ptr.vmem [resolvable:$false] %s619_s22 }
  0x38   : > { %s621_s28 = scalar_lea.vmem %s620_s22, 128  ;;  %p622_p1 = scmp.lt.s32.totalorder %s896_s4, %s620_s22 }
  0x39   : > { %p617_p0 = pnand %p615_p12, %p601_p13  ;;  %p623_p7 = scmp.lt.s32.totalorder %s621_s28, %s614_s21 }
  0x3b   : > { %p618_p5 = pneg %p617_p0  ;;  %p624_p3 = por %p623_p7, %p622_p1 }
  0x3d   : > { %p625_p4 = pnand %p624_p3, %p618_p5 }
  0x3f   : > { %628 = shalt.err (!%p625_p4)
}
  0x40   : > { %495 = dma.hbm_to_vmem [thread:$0]  (!%p905_p8), %s901_s10, 64, %s896_s4, %s140_s23  }
  0x41   : > { %p1036_p9 = scmp.lt.s32.totalorder %s751_s20, 9  ;;  %p1037_p11 = scmp.ge.s32.totalorder %s751_s20, 1 }
  0x43   : > { %p160_p13 = pnand %p1037_p11, %p1036_p9 }
  0x44   : > { %s165_s24 = sand.u32 (!%p160_p13), 1, %s727_s15  }
  0x45   : > { %163 = sbr.rel (%p160_p13) target bundleno = 892 (0x37c), region = 28  ;;  %s456_s26 = sshll.u32 (!%p160_p13), %s165_s24, 2 }
  0x46   : > { %s166_s29 = scalar_lea.sflag (!%p160_p13), [#allocation7], %s165_s24  ;;  %s169_s14 = scalar_lea.vmem (!%p160_p13), [#allocation6], %s456_s26 }
  0x4c   : > { %702 = dma.done.wait (%p864_p10), %s166_s29, 64  }
  0x4d   : > { %704 = vsyncadd (%p864_p10), %s166_s29, 4294967232  ;;  %s187_s8 = sand.u32 1, %s715_s12   ;;  %p458_p1 = scmp.ne.s32.totalorder %s735_s17, 0 }
  0x4e   : > { %s948_s4 = sshll.u32 %s187_s8, 2  ;;  %vm200_vm0 = vcmask (!%p458_p1), 27648   ;;  %v754_v0 = vmov (!%p458_p1), 0.0  }
  0x4f   : > { %s189_s10 = scalar_lea.vmem [#allocation9], %s948_s4  ;;  %199 = sbr.rel (%p458_p1) target bundleno = 86 (0x56), region = 36  ;;  %201 = vst.msk [vmem:[#allocation2] sm:$0xf] (!%p458_p1), %vm200_vm0, %v754_v0 }
  0x56 PF: > { %p459_p5 = scmp.ge.s32.totalorder %s735_s17, 2 }
  0x57   : > { %v206_v1 = vld [vmem:[%s169_s14] sm:$0xf] (!%p459_p5)  ;;  %s460_s5 = sshll.u32 (!%p459_p5), %s735_s17, 2  ;;  %v755_v2 = vmov (!%p459_p5), 0.0   ;;  %vm756_vm1 = vmmov (!%p459_p5), 0   ;;  %vm253_vm2 = vcmask (!%p459_p5), 27648  }
  0x58   : > { %205 = sbr.rel (%p459_p5) target bundleno = 312 (0x138), region = 40  ;;  %476 = vmatprep.subr.bf16.mxu0 (!%p459_p5), %v755_v2  ;;  %v210_v3 = vpack.c.bf16 (!%p459_p5), %v206_v1, %v206_v1  ;;  %478 = vmatprep.mubr.msk.bf16.mxu0 (!%p459_p5), %vm756_vm1, %v755_v2  ;;  %s208_s23 = scalar_lea.vmem (!%p459_p5), [#allocation4], %s460_s5  ;;  %v211_v4 = vld [vmem:[#allocation2] sm:$0xf] (!%p459_p5) }
  0x59   : > { %209 = vst [vmem:[%s208_s23] sm:$0xf] (!%p459_p5), %v206_v1 }
  0x5a   : > { %477 = vmatpush3.bf16.xpose.msra.mxu0 (!%p459_p5), %v210_v3 }
  0x61   : > { %479 = vmatmul.mubr.bf16.vlgmr.msra.gmra.mrb[0].mxu0 %v210_v3 }
 0x134   : > { %v246_v5 = vpop.f32.mrb[0].mxu0 }
 0x135   : > { %v252_v6 = vadd.f32 %v246_v5, %v211_v4  ;;  %v480_v7 = vpop.f32.mrb[1].mxu0 }
 0x136   : > { %v249_v8 = vpop.f32.mrb[2].mxu0 }
 0x137   : > { %254 = vst.msk [vmem:[#allocation2] sm:$0xf] %vm253_vm2, %v252_v6  ;;  %v481_v9 = vpop.f32.mrb[3].mxu0 }
 0x138 PF: > { %p461_p10 = scmp.ne.s32.totalorder %s735_s17, 2 }
 0x139   : > { %vm260_vm3 = vcmask (!%p461_p10), 27648   ;;  %vm273_vm4 = vcmask (!%p461_p10), 25600  }
 0x13a   : > { %258 = sbr.rel (%p461_p10) target bundleno = 636 (0x27c), region = 44 }
 0x13e   : > { %v259_v10 = vld [vmem:[#allocation2] sm:$0xf] (!%p461_p10) }
 0x13f   : > { %v261_v11 = vsel (!%p461_p10), %vm260_vm3, %v259_v10, -inf }
 0x140   : > { %262 = vmax.xlane.f32.xlu0 (!%p461_p10), %v261_v11 }
 0x1cd   : > { %v263_v12 = vpop.xlane.xlu0 %262 }
 0x1ce   : > { %v264_v13 = vsub.f32 %v259_v10, %v263_v12 }
 0x1d0   : > { %v265_v14 = vmul.f32 1.442695, %v264_v13 }
 0x1d2   : > { %595 = vpow2.f32 %v265_v14 }
 0x1dc   : > { %v596_v15 = vpop.eup %595 }
 0x1dd   : > { %v267_v16 = vsel %vm260_vm3, %v596_v15, 0.0 }
 0x1de   : > { %268 = vadd.xlane.f32.xlu0 %v267_v16 }
 0x26b   : > { %v269_v17 = vpop.xlane.xlu0 %268 }
 0x26c   : > { %597 = vrcp.f32 %v269_v17 }
 0x276   : > { %v598_v18 = vpop.eup %597 }
 0x277   : > { %v271_v19 = vmul.f32 %v598_v18, %v596_v15 }
 0x279   : > { %v272_v20 = vpack.c.bf16 %v271_v19, %v271_v19 }
 0x27b   : > { %274 = vst.msk [vmem:[#allocation3] sm:$0x3] %vm273_vm4, %v272_v20 }
 0x27c PF: > { %p462_p8 = scmp.lt.s32.totalorder %s735_s17, 2 }
 0x27d   : > { %s463_s30 = sadd.s32 (!%p462_p8), 4294967294, %s735_s17  ;;  %v757_v21 = vmov (!%p462_p8), 0.0   ;;  %vm758_vm5 = vmmov (!%p462_p8), 0   ;;  %vm289_vm6 = vcmask (!%p462_p8), 1041408   ;;  %vm285_vm7 = vcmask (!%p462_p8), 31744   ;;  %s333_s6 = sld [smem:[#allocation5]] (!%p462_p8) }
 0x27e   : > { %278 = sbr.rel (%p462_p8) target bundleno = 864 (0x360), region = 48  ;;  %482 = vmatprep.subr.bf16.mxu0 (!%p462_p8), %v757_v21  ;;  %s464_s3 = sshll.u32 (!%p462_p8), %s463_s30, 2  ;;  %484 = vmatprep.mubr.msk.bf16.mxu0 (!%p462_p8), %vm758_vm5, %v757_v21 }
 0x27f   : > { %s281_s21 = scalar_lea.vmem (!%p462_p8), [#allocation4], %s464_s3 }
 0x280   : > { %v282_v22 = vld [vmem:[%s281_s21] sm:$0xf] (!%p462_p8) }
 0x281   : > { %v284_v23 = vpack.c.bf16 (!%p462_p8), %v282_v22, %v282_v22 }
 0x282   : > { %v283_v25 = vld [vmem:[#allocation3] sm:$0x3] (!%p462_p8) }
 0x283   : > { %v291_v24 = vsel (!%p462_p8), %vm289_vm6, %v284_v23, 0  ;;  %v334_v26 = vstv (!%p462_p8), %s333_s6 }
 0x284   : > { %483 = vmatpush3.bf16.msra.mxu0 (!%p462_p8), %v291_v24 }
 0x287   : > { %485 = vmatmul.mubr.msk.bf16.vlgmr.msra.gmra.mrb[0].mxu0 %vm285_vm7, %v283_v25 }
 0x35a   : > { %v327_v27 = vpop.f32.mrb[0].mxu0 }
 0x35b   : > { %v335_v28 = vmul.f32 %v334_v26, %v327_v27  ;;  %v486_v29 = vpop.f32.mrb[1].mxu0 }
 0x35c   : > { %v330_v30 = vpop.f32.mrb[2].mxu0 }
 0x35d   : > { %v336_v31 = vadd.f32 %v335_v28, %v282_v22  ;;  %v487_v32 = vpop.f32.mrb[3].mxu0 }
 0x35f   : > { %337 = vst [vmem:[%s189_s10] sm:$0xf] %v336_v31 }
 0x360 PF: > { %s467_s22 = sadd.s32 4294967294, %s735_s17  ;;  %s468_s28 = sshll.u32 %s739_s18, 1 }
 0x361   : > { %p347_p2 = scmp.gt.s32.totalorder %s467_s22, 0  ;;  %s357_s24 = sshll.u32 %s189_s10, 4  ;;  %s963_s24 = int_to_ptr.vmem [resolvable:$true] %s357_s24 }
 0x362   : > { %s339_s30 = scalar_lea.sflag [#allocation8], %s187_s8  ;;  %s629_s3 = scalar_lea.vmem %s963_s24, 64 }
 0x363   : > { %s1063_s22 = smov (!%p347_p2, %s467_s22), 0  ;;  %p630_p6 = scmp.ne.s32.totalorder %s963_s24, %s629_s3 }
 0x364   : > { %s353_s26 = sadd.s32 %s468_s28, %s1063_s22  ;;  %p1038_p12 = scmp.ne.s32.totalorder %s1033_s9, 0 }
 0x365   : > { %s469_s29 = sshll.u32 %s353_s26, 6  ;;  %s759_s17 = smov [#allocation9]  }
 0x366   : > { %s355_s23 = scalar_lea.hbm %s1025_s2, %s469_s29  ;;  %p631_p0 = pnand %p630_p6, %p1038_p12 }
 0x367   : > { %s633_s18 = sshll.u32 %s759_s17, 4  ;;  %s634_s18 = int_to_ptr.vmem [resolvable:$false] %s633_s18 }
 0x368   : > { %p632_p7 = pneg %p631_p0  ;;  %s635_s4 = scalar_lea.vmem %s634_s18, 128 }
 0x369   : > { %p636_p3 = scmp.lt.s32.totalorder %s963_s24, %s634_s18  ;;  %p637_p4 = scmp.lt.s32.totalorder %s635_s4, %s629_s3 }
 0x36b   : > { %p638_p9 = por %p637_p4, %p636_p3 }
 0x36d   : > { %p639_p11 = pnand %p638_p9, %p632_p7 }
 0x36f   : > { %642 = shalt.err (!%p639_p11)
}
 0x370   : > { %s643_s10 = scalar_lea.hbm %s355_s23, 64  ;;  %s647_s6 = scalar_lea.hbm %s1025_s2, 256 }
 0x371   : > { %p644_p13 = scmp.ne.s32.totalorder %s355_s23, %s643_s10  ;;  %p648_p10 = scmp.lt.u32.totalorder %s355_s23, %s1025_s2 }
 0x372   : > { %p649_p8 = scmp.lt.u32.totalorder %s647_s6, %s643_s10  ;;  %p651_p6 = scmp.lt.u32.totalorder %s643_s10, %s355_s23 }
 0x373   : > { %p645_p1 = pnand %p644_p13, %p1038_p12 }
 0x374   : > { %p650_p2 = por %p649_p8, %p648_p10 }
 0x375   : > { %p646_p5 = pneg %p645_p1 }
 0x376   : > { %p652_p0 = por %p651_p6, %p650_p2 }
 0x378   : > { %p653_p7 = pnand %p652_p0, %p646_p5 }
 0x37a   : > { %656 = shalt.err (!%p653_p7)
}
 0x37b   : > { %490 = dma.vmem_to_hbm [thread:$0]  (%p1038_p12), %s963_s24, 64, %s355_s23, %s339_s30  }
 0x37c PF: > { %p501_p3 = scmp.ge.s32.totalorder %s751_s20, 2  ;;  %s369_s26 = sand.u32 1, %s711_s11  }
 0x37d   : > { %p1039_p4 = scmp.ne.s32.totalorder %s1034_s25, 0  ;;  %s370_s29 = scalar_lea.sflag [#allocation8], %s369_s26 }
 0x37f   : > { %p497_p9 = pnand %p501_p3, %p1039_p4 }
 0x381   : > { %706 = dma.done.wait (!%p497_p9), %s370_s29, 64  }
 0x382   : > { %708 = vsyncadd (!%p497_p9), %s370_s29, 4294967232  ;;  %s19_s20 = sadd.s32 1, %s751_s20   ;;  %s1040_s9 = sld [smem:[#allocation12_spill]] }
 0x383   : > { %p16_p11 = scmp.ge.s32.totalorder %s19_s20, 10   ;;  %s1041_s24 = sld [smem:[#allocation13_spill]] }
 0x384   : > { %s1042_s11 = smov %s715_s12  ;;  %s1043_s12 = smov %s719_s13 }
 0x385   : > { %s1044_s13 = smov %s892_s27  ;;  %s1045_s14 = smov %s727_s15 }
 0x386   : > { %s1046_s15 = smov %s731_s16  ;;  %s1047_s16 = smov %s870_s7 }
 0x387   : > { %s1048_s17 = smov %s743_s0  ;;  %s1049_s18 = smov %s747_s19 }
 0x388   : > { %s1050_s0 = smov %s1040_s9  ;;  %18 = sbr.rel (!%p16_p11) target bundleno = 11 (0xb), region = 91 }
 0x389   : > { %s1051_s19 = smov %s1041_s24 }
 0x38f   :  { %375 = vsyncpa [#allocation7], 1 }
 0x390   :  { %377 = vsyncpa [#allocation7 + $0x1], 1 }
 0x391   :  { %378 = vsyncpa [#allocation8], 1 }
 0x392   :  { %380 = vsyncpa [#allocation8 + $0x1], 1 }

</bundles_post_ra>
